<compile_context>
chip_gen: v7x
topology: tpu7x:2x2x1
jax: 0.10.0
libtpu: 0.0.40
codegen_flags: <defaults>
</compile_context>

<pallas_src>
import functools

import jax
import jax.numpy as jnp
from jax.experimental import pallas as pl
from jax.experimental.pallas import tpu as pltpu


def patch_embed_kernel(p_ref, w_ref, posb_ref, o_ref):
    """One grid step = `bpb` whole images.

    p_ref:    (bpb, D, N) bf16  per-image patch matrices (columns = patches)
    w_ref:    (E, D)      bf16  flattened conv weight, resident across the grid
    posb_ref: (E, N)      f32   pos_emb in raw-view orientation + conv bias, resident
    o_ref:    (bpb, E, N)       conv-output memory orientation -> torch's .view(B,N,E)
                                becomes a metadata-only reshape outside the kernel.
    """
    w = w_ref[...]
    posb = posb_ref[...]
    # Static unroll over the (small) per-step image count; the weight operand stays
    # MXU-stationary across the bpb matmuls, each (E, N) result is stored immediately.
    for bi in range(p_ref.shape[0]):
        acc = jnp.dot(w, p_ref[bi], preferred_element_type=jnp.float32)  # MXU, f32 acc
        o_ref[bi] = (acc + posb).astype(o_ref.dtype)                     # f32 epilogue, cast at store


def patch_embedding(x, conv_w, conv_b, pos_emb, patch_size, *,
                    batches_per_block=None,
                    mxu_dtype=jnp.bfloat16,
                    out_dtype=jnp.bfloat16,
                    vmem_budget_bytes=24 * 1024 * 1024):
    """x: (B, 3, H, W) float32 (NCHW).  Returns (B, num_patches, emb_dim), matching
    torch's `conv(x).view(B, num_patches, emb_dim) + pos_emb` (bf16 output by default;
    pass out_dtype=jnp.float32 for the exact torch dtype)."""
    B, C, H, W = x.shape
    E = conv_w.shape[0]
    P = patch_size
    Hp, Wp = H // P, W // P
    N = Hp * Wp                       # num_patches
    D = C * P * P                     # patch_dim

    # ---- glue: patchify (layout plumbing only; one fused XLA pass over x) ----
    # Rows of D ordered (c, i, j) to match the flattened conv weight; columns = patches in
    # (hp, wp) order, i.e. the per-image (D, N) rhs of the conv-as-GEMM.  bf16 cast in the
    # same pass so the patch HBM stream is half width.
    # TODO(synk): fold this HBM->HBM patchify transpose into the kernel via manual DMA.
    xp = x.reshape(B, C, Hp, P, Wp, P).transpose(0, 1, 3, 5, 2, 4)
    xp = xp.reshape(B, D, N).astype(mxu_dtype)

    wf = conv_w.reshape(E, D).astype(mxu_dtype)               # (E, D)

    # torch's `.view(B, N, E)` is a raw reinterpretation of the (B, E, N) conv output.  The
    # kernel writes that orientation directly, so pos_emb only needs the matching raw
    # reinterpretation (pure reshape, no transpose); the conv bias (broadcast over patches)
    # is folded into the same resident operand -> one fewer DMA stream.
    posb = pos_emb.reshape(E, N).astype(jnp.float32) + conv_b.astype(jnp.float32)[:, None]

    # ---- images per grid step ----
    def _vmem_estimate(bpb):
        streamed = 2 * bpb * D * N * jnp.dtype(mxu_dtype).itemsize       # patches, 2 bufs
        streamed += 2 * bpb * E * N * jnp.dtype(out_dtype).itemsize      # output, 2 bufs
        resident = E * D * jnp.dtype(mxu_dtype).itemsize + E * N * 4     # weight + pos/bias
        return streamed + resident

    if batches_per_block is None:
        # Target ~8 images/step (amortizes ~0.35us grid-step overhead), keep grid extent >= 2
        # where possible (v7x 2-TC sharding of the "parallel" axis), stay within a conservative
        # VMEM budget (v5e 16 MiB / v7x 32 MiB scoped defaults), and keep bpb a divisor of B.
        bpb = min(B, 8, max(1, B // 2))
        while B % bpb:
            bpb -= 1
        while bpb > 1 and _vmem_estimate(bpb) > vmem_budget_bytes:
            bpb -= 1
            while B % bpb:
                bpb -= 1
        batches_per_block = bpb
    assert B % batches_per_block == 0
    bpb = batches_per_block

    grid = (B // bpb,)

    out_std = pl.pallas_call(
        patch_embed_kernel,
        out_shape=jax.ShapeDtypeStruct((B, E, N), out_dtype),
        grid=grid,
        in_specs=[
            # Patches: streamed per grid step.  (Add pipeline_mode=pl.Buffered(3) here if
            # xprof shows exposed DMA after enlarging bpb.)
            pl.BlockSpec((bpb, D, N), lambda t: (t, 0, 0)),
            pl.BlockSpec((E, D), lambda t: (0, 0)),           # weight: resident
            pl.BlockSpec((E, N), lambda t: (0, 0)),           # pos_emb + bias: resident
        ],
        out_specs=pl.BlockSpec((bpb, E, N), lambda t: (t, 0, 0)),
        compiler_params=pltpu.CompilerParams(
            dimension_semantics=("parallel",),
        ),
    )(xp, wf, posb)

    # ---- torch `.view(B, N, E)`: metadata-only row-major reshape (no data movement) ----
    return out_std.reshape(B, N, E)


def _reference(x, conv_w, conv_b, pos_emb, patch_size):
    """Pure-JAX f32 reference with the torch module's exact semantics (incl. the raw .view)."""
    B, C, H, W = x.shape
    E = conv_w.shape[0]
    P = patch_size
    Hp, Wp = H // P, W // P
    N = Hp * Wp
    xp = x.reshape(B, C, Hp, P, Wp, P).transpose(0, 1, 3, 5, 2, 4).reshape(B, C * P * P, N)
    conv = jnp.einsum("ed,bdn->ben", conv_w.reshape(E, -1), xp) + conv_b[None, :, None]
    y = conv.reshape(B, N, E)        # torch .view: raw row-major memory reinterpretation
    return y + pos_emb


if __name__ == "__main__":
    # Small shapes consistent with the module: img_size=16, patch_size=4, emb_dim=32, batch=2.
    # (Toy dims only validate correctness; perf claims should be checked at real ViT dims.)
    img_size, patch_size, emb_dim, batch = 16, 4, 32, 2
    num_patches = (img_size // patch_size) ** 2          # 16

    key = jax.random.PRNGKey(0)
    k_x, k_w, k_b, k_pos = jax.random.split(key, 4)

    x = jax.random.normal(k_x, (batch, 3, img_size, img_size), dtype=jnp.float32)
    conv_w = jax.random.normal(k_w, (emb_dim, 3, patch_size, patch_size),
                               dtype=jnp.float32) * 0.02
    conv_b = jax.random.normal(k_b, (emb_dim,), dtype=jnp.float32) * 0.02
    pos_emb = jax.random.normal(k_pos, (1, num_patches, emb_dim), dtype=jnp.float32)

    # jit the wrapper so the patchify transpose + bf16 cast fuse into one XLA pass.
    fn = jax.jit(functools.partial(patch_embedding, patch_size=patch_size))
    out = fn(x, conv_w, conv_b, pos_emb)          # default heuristic -> bpb=1, grid=(2,)
    out = jax.block_until_ready(out)

    ref = _reference(x, conv_w, conv_b, pos_emb, patch_size)
    assert out.shape == (batch, num_patches, emb_dim), out.shape
    assert out.dtype == jnp.bfloat16, out.dtype
    # bf16 MXU inputs + bf16 output (f32 accumulate/epilogue) -> loose tolerance vs f32 ref.
    err = float(jnp.max(jnp.abs(out.astype(jnp.float32) - ref)))
    assert jnp.allclose(out.astype(jnp.float32), ref, atol=3e-2, rtol=3e-2), err

    print("KERNEL_OK")
</pallas_src>

<mosaic_0001>
module attributes {stable_mosaic.version = 11 : i64} {
  func.func @patch_embed_kernel(%arg0: i32, %arg1: memref<1x48x16xbf16, #tpu.memory_space<vmem>>, %arg2: memref<32x48xbf16, #tpu.memory_space<vmem>>, %arg3: memref<32x16xf32, #tpu.memory_space<vmem>>, %arg4: memref<1x32x16xbf16, #tpu.memory_space<vmem>>) attributes {dimension_semantics = [#tpu.dimension_semantics<parallel>], iteration_bounds = array<i64: 2>, scalar_prefetch = 0 : i64, scratch_operands = 0 : i64, tpu.core_type = #tpu.core_type<tc>, window_params = [{transform_indices = @transform_0, window_bounds = array<i64: 1, 48, 16>}, {pipeline_mode = #tpu.pipeline_mode<synchronous>, transform_indices = @transform_1, window_bounds = array<i64: 32, 48>}, {pipeline_mode = #tpu.pipeline_mode<synchronous>, transform_indices = @transform_2, window_bounds = array<i64: 32, 16>}, {transform_indices = @transform_3, window_bounds = array<i64: 1, 32, 16>}]} {
    %c0 = arith.constant 0 : index
    %c0_0 = arith.constant 0 : index
    %0 = vector.load %arg2[%c0, %c0_0] : memref<32x48xbf16, #tpu.memory_space<vmem>>, vector<32x48xbf16>
    %c0_1 = arith.constant 0 : index
    %c0_2 = arith.constant 0 : index
    %1 = vector.load %arg3[%c0_1, %c0_2] : memref<32x16xf32, #tpu.memory_space<vmem>>, vector<32x16xf32>
    %c0_3 = arith.constant 0 : index
    %c0_4 = arith.constant 0 : index
    %c0_5 = arith.constant 0 : index
    %2 = vector.load %arg1[%c0_3, %c0_4, %c0_5] : memref<1x48x16xbf16, #tpu.memory_space<vmem>>, vector<1x48x16xbf16>
    %3 = vector.shape_cast %2 : vector<1x48x16xbf16> to vector<48x16xbf16>
    %cst = arith.constant dense<0.000000e+00> : vector<32x16xf32>
    %4 = tpu.matmul %0, %3, %cst {dimension_numbers = #tpu.dot_dimension_numbers<[1], [0], [0], [1], [0, 0, 1, 1], [], []>} : vector<32x48xbf16>, vector<48x16xbf16>, vector<32x16xf32> -> vector<32x16xf32>
    %5 = arith.addf %4, %1 : vector<32x16xf32>
    %6 = arith.truncf %5 : vector<32x16xf32> to vector<32x16xbf16>
    %c0_6 = arith.constant 0 : index
    %c0_7 = arith.constant 0 : index
    %c0_8 = arith.constant 0 : index
    %7 = vector.load %arg4[%c0_6, %c0_7, %c0_8] : memref<1x32x16xbf16, #tpu.memory_space<vmem>>, vector<1x32x16xbf16>
    %8 = vector.shape_cast %7 : vector<1x32x16xbf16> to vector<32x16xbf16>
    %9 = vector.shape_cast %6 : vector<32x16xbf16> to vector<1x32x16xbf16>
    tpu.vector_store %arg4[%c0_6, %c0_7, %c0_8], %9 {strides = array<i32>} : memref<1x32x16xbf16, #tpu.memory_space<vmem>>, vector<1x32x16xbf16>,
    return
  }
  func.func @transform_0(%arg0: i32) -> (i32, i32, i32) {
    %c0_i32 = arith.constant 0 : i32
    %c0_i32_0 = arith.constant 0 : i32
    %c0_i32_1 = arith.constant 0 : i32
    return %arg0, %c0_i32, %c0_i32_0 : i32, i32, i32
  }
  func.func @transform_1(%arg0: i32) -> (i32, i32) {
    %c0_i32 = arith.constant 0 : i32
    %c0_i32_0 = arith.constant 0 : i32
    %c0_i32_1 = arith.constant 0 : i32
    return %c0_i32, %c0_i32_0 : i32, i32
  }
  func.func @transform_2(%arg0: i32) -> (i32, i32) {
    %c0_i32 = arith.constant 0 : i32
    %c0_i32_0 = arith.constant 0 : i32
    %c0_i32_1 = arith.constant 0 : i32
    return %c0_i32, %c0_i32_0 : i32, i32
  }
  func.func @transform_3(%arg0: i32) -> (i32, i32, i32) {
    %c0_i32 = arith.constant 0 : i32
    %c0_i32_0 = arith.constant 0 : i32
    %c0_i32_1 = arith.constant 0 : i32
    return %arg0, %c0_i32, %c0_i32_0 : i32, i32, i32
  }
}

</mosaic_0001>

<bundles_post_ra>
// kernel: patch_embedding.1
= control target key start
LH: loop header
LB: loop body
LE: loop exit
PB: predicated region body
PF: predicated region fallthrough
CT: control target
= control target key end

     0   :  { %s429_s12 = smov 0   ;;  %s464_s0 = inlined_call_operand.vmem [shape: bf16[2,48,16], index: 0, kind: input, shape index: {}]   ;;  %s465_s1 = inlined_call_operand.vmem [shape: bf16[32,48], index: 1, kind: input, shape index: {}]   ;;  %s466_s2 = inlined_call_operand.vmem [shape: f32[32,16], index: 2, kind: input, shape index: {}]   ;;  %s467_s3 = inlined_call_operand.vmem [shape: bf16[2,32,16], index: 3, kind: output, shape index: {}]  }
   0x1 LB: > { %s346_s13 = sadd.s32 4294967295, %s407_s12   ;;  %p350_p0 = scmp.ge.s32.totalorder %s407_s12, 1  ;;  %s407_s12 = sphi %s429_s12, %s13_s12  }
   0x2   : > { %p137_p1 = scmp.lt.s32.totalorder %s407_s12, 3 }
   0x4   : > { %p138_p2 = pnand %p350_p0, %p137_p1 }
   0x5   : > { %p161_p3 = scmp.lt.s32.totalorder (!%p138_p2), %s346_s13, 1  ;;  %v399_v0 = vld [vmem:[%s465_s1] sm:$0xff] (!%p138_p2)   ;;  %vm214_vm0 = vcmask (!%p138_p2), 392192   ;;  %v400_v4 = vld [vmem:[%s465_s1 + $0x8] sm:$0xff] (!%p138_p2)   ;;  %v178_v5 = vld [vmem:[%s466_s2 + $0x10] sm:$0xff] (!%p138_p2)  ;;  %vm286_vm1 = vcmask (!%p138_p2), 125952  }
   0x6   : > { %141 = sbr.rel (%p138_p2) target bundleno = 250 (0xfa), region = 32  ;;  %383 = vmatprep.mubr.msk.bf16.mxu0 (!%p138_p2), %vm214_vm0, %v399_v0  ;;  %v176_v6 = vld [vmem:[%s466_s2] sm:$0xff] (!%p138_p2)  ;;  %v179_v8 = vld [vmem:[%s466_s2 + $0x18] sm:$0xff] (!%p138_p2)  ;;  %v177_v11 = vld [vmem:[%s466_s2 + $0x8] sm:$0xff] (!%p138_p2) }
   0xd   : > { %s469_s13 = smov (!%p161_p3, %s346_s13), 1 }
   0xe   : > { %s387_s16 = smul.u32 24, %s469_s13  ;;  %s367_s24 = sshll.u32 %s469_s13, 4 }
   0xf   : > { %s170_s6 = scalar_lea.vmem %s467_s3, %s367_s24 }
  0x10   : > { %s165_s19 = scalar_lea.vmem %s464_s0, %s387_s16 }
  0x11   : > { %v396_v1 = vld [vmem:[%s165_s19] sm:$0xff]   ;;  %v397_v2 = vld [vmem:[%s165_s19 + $0x8] sm:$0xff]   ;;  %v398_v3 = vld [vmem:[%s165_s19 + $0x10] sm:$0xff]  }
  0x12   : > { %377 = vmatprep.subr.bf16.mxu0 %v396_v1 }
  0x13   : > { %378 = vmatpush3.bf16.msra.mxu0 %v396_v1 }
  0x14   : > { %379 = vmatprep.subr.bf16.mxu0 %v397_v2 }
  0x17   : > { %380 = vmatpush3.bf16.msra.mxu0 %v397_v2 }
  0x18   : > { %381 = vmatprep.subr.bf16.mxu0 %v398_v3 }
  0x1b   : > { %382 = vmatpush3.bf16.msra.mxu0 %v398_v3 }
  0x1e   : > { %384 = vmatmul.mubr.msk.bf16.vlgmr.msra.gmra.mrb[0].mxu0 %vm214_vm0, %v400_v4 }
  0xf1   : > { %v385_v7 = vpop.f32.mrb[0].mxu0 }
  0xf2   : > { %v264_v9 = vadd.f32 %v385_v7, %v178_v5  ;;  %v255_v10 = vpop.f32.mrb[1].mxu0 }
  0xf3   : > { %v256_v12 = vadd.f32 %v255_v10, %v176_v6  ;;  %v386_v13 = vpop.f32.mrb[2].mxu0 }
  0xf4   : > { %v370_v14 = vpack.c.bf16 %v264_v9, %v264_v9  ;;  %v267_v15 = vadd.f32 %v386_v13, %v179_v8  ;;  %v258_v16 = vpop.f32.mrb[3].mxu0 }
  0xf5   : > { %v368_v17 = vpack.c.bf16 %v256_v12, %v256_v12  ;;  %v259_v18 = vadd.f32 %v258_v16, %v177_v11 }
  0xf6   : > { %289 = vst.msk [vmem:[%s170_s6 + $0x8] sm:$0xf] %vm286_vm1, %v370_v14  ;;  %v371_v19 = vpack.c.bf16 %v267_v15, %v267_v15 }
  0xf7   : > { %287 = vst.msk [vmem:[%s170_s6] sm:$0xf] %vm286_vm1, %v368_v17  ;;  %v369_v20 = vpack.c.bf16 %v259_v18, %v259_v18 }
  0xf8   : > { %290 = vst.msk [vmem:[%s170_s6 + $0xc] sm:$0xf] %vm286_vm1, %v371_v19 }
  0xf9   : > { %288 = vst.msk [vmem:[%s170_s6 + $0x4] sm:$0xf] %vm286_vm1, %v369_v20 }
  0xfa PF: > { %s13_s12 = sadd.s32 1, %s407_s12  }
  0xfb   : > { %p10_p4 = scmp.ge.s32.totalorder %s13_s12, 4  }
  0xfd   :  { %12 = sbr.rel (!%p10_p4) target bundleno = 1 (0x1), region = 62 }

</bundles_post_ra>
